<compile_context>
chip_gen: v7x
topology: tpu7x:2x2x1
jax: 0.10.0
libtpu: 0.0.40
codegen_flags: <defaults>
</compile_context>

<pallas_src>
import functools

import jax
import jax.numpy as jnp
from jax.experimental import pallas as pl
from jax.experimental.pallas import tpu as pltpu

_SUBLANE = 8
_LANE = 128
_MIB = 1024 * 1024


def _round_up(x, m):
    return (x + m - 1) // m * m


def _int_pow(x, n):
    """x**n for static integer n >= 1 via a multiply chain (stays on the VPU)."""
    acc = None
    base = x
    while n > 0:
        if n & 1:
            acc = base if acc is None else acc * base
        n >>= 1
        if n:
            base = base * base
    return acc


def _choose_blocks(N, D, itemsize, tile_budget_bytes):
    """Pick (block_n, block_d) so one input tile fits the per-tile VMEM budget."""
    n_cap = min(_round_up(N, _SUBLANE), 1024)
    rows = (tile_budget_bytes // max(D * itemsize, 1)) // _SUBLANE * _SUBLANE
    if rows >= _SUBLANE:
        # Full-D blocks, as many rows as the budget allows.
        bn = max(_SUBLANE, min(rows, n_cap))
        # Even out the row blocks so padding waste stays small for ragged N.
        n_blocks = -(-N // bn)
        bn = _round_up(-(-N // n_blocks), _SUBLANE)
        return bn, D
    # D too large for even an 8-row full-D tile: tile the reduction axis too.
    block_n = min(256, n_cap)
    block_d = max(_LANE,
                  (tile_budget_bytes // (block_n * itemsize)) // _LANE * _LANE)
    block_d = min(block_d, _round_up(D, _LANE))
    return block_n, block_d


def _pairwise_distance_kernel(x1_ref, x2_ref, o_ref, acc_ref, *,
                              p, inv_p, eps, pad_correction):
    k = pl.program_id(1)

    @pl.when(k == 0)
    def _init():
        acc_ref[...] = jnp.zeros_like(acc_ref)

    # Compute in f32 (safe on v5e which has no bf16 VPU/EUP); bf16 inputs still
    # get the HBM-traffic win since the upcast happens after the load.
    x1 = x1_ref[...].astype(jnp.float32)
    x2 = x2_ref[...].astype(jnp.float32)
    diff = jnp.abs(x1 - x2) + eps                          # (bn, bd), > 0 for eps > 0

    p_int = int(p) if float(p) == int(p) else None
    if p_int == 1:
        part = diff
    elif p_int == 2:
        part = diff * diff
    elif p_int is not None and p_int >= 3:
        part = _int_pow(diff, p_int)                       # VPU multiply chain
    else:
        part = jnp.exp(jnp.log(diff) * p)                  # true float p: EUP exp/log

    acc_ref[...] += jnp.sum(part, axis=-1, keepdims=True)

    @pl.when(k == pl.num_programs(1) - 1)
    def _finalize():
        s = acc_ref[...]
        if pad_correction != 0.0:
            s = s - pad_correction                         # remove zero-padded D columns
        if p_int == 1:
            out = s
        elif p_int == 2:
            out = jnp.sqrt(s)
        else:
            out = jnp.exp(jnp.log(s) * inv_p)              # only (bn, 1) transcendentals
        o_ref[...] = out.astype(o_ref.dtype)


def pairwise_distance(x1, x2, p=2, eps=1e-6, *,
                      block_n=None, block_d=None,
                      tile_budget_bytes=2 * _MIB):
    """Pallas TPU implementation of (old) nn.PairwiseDistance(p, eps)(x1, x2)."""
    assert x1.shape == x2.shape, "Input sizes must be equal."
    assert x1.ndim == 2, "Input must be a 2D matrix."
    N, D = x1.shape
    itemsize = jnp.dtype(x1.dtype).itemsize

    bn, bd = _choose_blocks(N, D, itemsize, tile_budget_bytes)
    if block_n is not None:
        bn = block_n
    if block_d is not None:
        bd = block_d

    n_pad = _round_up(N, bn)
    d_pad = _round_up(D, bd)
    if (n_pad, d_pad) != (N, D):
        pad = ((0, n_pad - N), (0, d_pad - D))
        x1 = jnp.pad(x1, pad)
        x2 = jnp.pad(x2, pad)
    # Each zero-padded D column contributes (|0-0| + eps)^p to every row's sum.
    pad_correction = float(d_pad - D) * float(eps) ** float(p)

    grid = (n_pad // bn, d_pad // bd)

    kernel = functools.partial(
        _pairwise_distance_kernel,
        p=p, inv_p=1.0 / p, eps=float(eps), pad_correction=pad_correction)

    # Size scoped VMEM explicitly: 2 inputs x 2 pipeline buffers x tile, plus
    # the (tiny) double-buffered output block and the accumulator scratch.
    needed = 2 * 2 * bn * bd * itemsize + 2 * bn * itemsize + bn * 4
    vmem_limit = int(min(48 * _MIB, max(32 * _MIB, 2 * needed)))

    out = pl.pallas_call(
        kernel,
        out_shape=jax.ShapeDtypeStruct((n_pad, 1), x1.dtype),
        grid_spec=pltpu.PrefetchScalarGridSpec(
            num_scalar_prefetch=0,
            grid=grid,
            in_specs=[
                pl.BlockSpec((bn, bd), lambda i, k: (i, k)),
                pl.BlockSpec((bn, bd), lambda i, k: (i, k)),
            ],
            out_specs=pl.BlockSpec((bn, 1), lambda i, k: (i, 0)),
            scratch_shapes=[pltpu.VMEM((bn, 1), jnp.float32)],
        ),
        compiler_params=pltpu.CompilerParams(
            dimension_semantics=("parallel", "arbitrary"),
            vmem_limit_bytes=vmem_limit,
        ),
    )(x1, x2)

    return out[:N]


if __name__ == "__main__":
    def reference(a, b, p, eps):
        d = jnp.abs(a - b) + eps
        s = jnp.sum(jnp.power(d, p), axis=1, keepdims=True)
        return jnp.power(s, 1.0 / p)

    key = jax.random.PRNGKey(0)
    cases = [
        # (N,   D,   p,   eps,  extra kwargs)
        (128, 256, 2,   1e-6, {}),                    # module defaults
        (100, 200, 2,   1e-6, {}),                    # ragged N and D (padding path)
        (128, 256, 3,   1e-6, {}),                    # integer-p multiply chain
        (128, 256, 1,   1e-6, {}),                    # L1
        (32,  256, 2.5, 1e-6, {}),                    # true float p (exp/log path)
        (64,  384, 2,   1e-6, {"block_d": 128}),      # D-tiled reduction/accumulator
    ]
    for (N, D, p, eps, kw) in cases:
        key, k1, k2 = jax.random.split(key, 3)
        x1 = jax.random.normal(k1, (N, D), dtype=jnp.float32)
        x2 = jax.random.normal(k2, (N, D), dtype=jnp.float32)
        out = jax.block_until_ready(pairwise_distance(x1, x2, p=p, eps=eps, **kw))
        ref = reference(x1, x2, p, eps)
        assert out.shape == (N, 1), (out.shape, N)
        assert jnp.allclose(out, ref, rtol=1e-5, atol=1e-5), (N, D, p)
    print("KERNEL_OK")
</pallas_src>

<mosaic_0001>
module attributes {stable_mosaic.version = 11 : i64} {
  func.func @_pairwise_distance_kernel(%arg0: i32, %arg1: i32, %arg2: memref<128x256xf32, #tpu.memory_space<vmem>>, %arg3: memref<128x256xf32, #tpu.memory_space<vmem>>, %arg4: memref<128x1xf32, #tpu.memory_space<vmem>>, %arg5: memref<128x1xf32, #tpu.memory_space<vmem>>) attributes {dimension_semantics = [#tpu.dimension_semantics<parallel>, #tpu.dimension_semantics<arbitrary>], iteration_bounds = array<i64: 1, 1>, scalar_prefetch = 0 : i64, scratch_operands = 1 : i64, tpu.core_type = #tpu.core_type<tc>, window_params = [{transform_indices = @transform_0, window_bounds = array<i64: 128, 256>}, {transform_indices = @transform_1, window_bounds = array<i64: 128, 256>}, {transform_indices = @transform_2, window_bounds = array<i64: 128, 1>}]} {
    %c0_i32 = arith.constant 0 : i32
    %0 = arith.cmpi eq, %arg1, %c0_i32 : i32
    %1 = arith.extui %0 : i1 to i32
    %c0_i32_0 = arith.constant 0 : i32
    %2 = arith.cmpi ne, %1, %c0_i32_0 : i32
    scf.if %2 {
      %cst_11 = arith.constant 0.000000e+00 : f32
      %18 = vector.broadcast %cst_11 : f32 to vector<128x1xf32>
      %c0_12 = arith.constant 0 : index
      %c0_13 = arith.constant 0 : index
      %19 = vector.load %arg5[%c0_12, %c0_13] : memref<128x1xf32, #tpu.memory_space<vmem>>, vector<128x1xf32>
      tpu.vector_store %arg5[%c0_12, %c0_13], %18 {strides = array<i32>} : memref<128x1xf32, #tpu.memory_space<vmem>>, vector<128x1xf32>,
    } else {
    }
    %c0 = arith.constant 0 : index
    %c0_1 = arith.constant 0 : index
    %3 = vector.load %arg2[%c0, %c0_1] : memref<128x256xf32, #tpu.memory_space<vmem>>, vector<128x256xf32>
    %c0_2 = arith.constant 0 : index
    %c0_3 = arith.constant 0 : index
    %4 = vector.load %arg3[%c0_2, %c0_3] : memref<128x256xf32, #tpu.memory_space<vmem>>, vector<128x256xf32>
    %5 = arith.subf %3, %4 : vector<128x256xf32>
    %6 = math.absf %5 : vector<128x256xf32>
    %cst = arith.constant 9.99999997E-7 : f32
    %7 = vector.broadcast %cst : f32 to vector<128x256xf32>
    %8 = arith.addf %6, %7 : vector<128x256xf32>
    %9 = arith.mulf %8, %8 : vector<128x256xf32>
    %c0_4 = arith.constant 0 : index
    %c0_5 = arith.constant 0 : index
    %10 = vector.load %arg5[%c0_4, %c0_5] : memref<128x1xf32, #tpu.memory_space<vmem>>, vector<128x1xf32>
    %cst_6 = arith.constant dense<0.000000e+00> : vector<128xf32>
    %11 = vector.multi_reduction <add>, %9, %cst_6 [1] : vector<128x256xf32> to vector<128xf32>
    %12 = vector.shape_cast %11 : vector<128xf32> to vector<128x1xf32>
    %13 = arith.addf %10, %12 : vector<128x1xf32>
    %c0_7 = arith.constant 0 : index
    %c0_8 = arith.constant 0 : index
    %14 = vector.load %arg5[%c0_7, %c0_8] : memref<128x1xf32, #tpu.memory_space<vmem>>, vector<128x1xf32>
    tpu.vector_store %arg5[%c0_7, %c0_8], %13 {strides = array<i32>} : memref<128x1xf32, #tpu.memory_space<vmem>>, vector<128x1xf32>,
    %c0_i32_9 = arith.constant 0 : i32
    %15 = arith.cmpi eq, %arg1, %c0_i32_9 : i32
    %16 = arith.extui %15 : i1 to i32
    %c0_i32_10 = arith.constant 0 : i32
    %17 = arith.cmpi ne, %16, %c0_i32_10 : i32
    scf.if %17 {
      %c0_11 = arith.constant 0 : index
      %c0_12 = arith.constant 0 : index
      %18 = vector.load %arg5[%c0_11, %c0_12] : memref<128x1xf32, #tpu.memory_space<vmem>>, vector<128x1xf32>
      %19 = math.sqrt %18 : vector<128x1xf32>
      %c0_13 = arith.constant 0 : index
      %c0_14 = arith.constant 0 : index
      %20 = vector.load %arg4[%c0_13, %c0_14] : memref<128x1xf32, #tpu.memory_space<vmem>>, vector<128x1xf32>
      tpu.vector_store %arg4[%c0_13, %c0_14], %19 {strides = array<i32>} : memref<128x1xf32, #tpu.memory_space<vmem>>, vector<128x1xf32>,
    } else {
    }
    return
  }
  func.func @transform_0(%arg0: i32, %arg1: i32) -> (i32, i32) {
    %c0_i32 = arith.constant 0 : i32
    return %arg0, %arg1 : i32, i32
  }
  func.func @transform_1(%arg0: i32, %arg1: i32) -> (i32, i32) {
    %c0_i32 = arith.constant 0 : i32
    return %arg0, %arg1 : i32, i32
  }
  func.func @transform_2(%arg0: i32, %arg1: i32) -> (i32, i32) {
    %c0_i32 = arith.constant 0 : i32
    %c0_i32_0 = arith.constant 0 : i32
    return %arg0, %c0_i32 : i32, i32
  }
}

</mosaic_0001>

<bundles_post_ra>
// kernel: tpu_custom_call.1
= control target key start
LH: loop header
LB: loop body
LE: loop exit
PB: predicated region body
PF: predicated region fallthrough
CT: control target
= control target key end

     0   :  { %7 = vsyncpa [#allocation4], 0  ;;  %s807_s0 = inlined_call_operand.hbm [shape: f32[128,256], index: 0, kind: input, shape index: {}]   ;;  %s808_s1 = inlined_call_operand.hbm [shape: f32[128,256], index: 1, kind: input, shape index: {}]   ;;  %s809_s2 = inlined_call_operand.vmem [shape: f32[128,1], index: 2, kind: output, shape index: {}]  }
   0x1   :  { %8 = vsyncpa [#allocation6], 0  ;;  %s587_s9 = smov [#allocation3]   ;;  %s539_s13 = scalar_lea.hbm %s807_s0, 4096 }
   0x2   :  { %s14_s10 = sshll.u32 %s587_s9, 4  ;;  %p540_p0 = scmp.ne.s32.totalorder %s807_s0, %s539_s13  ;;  %s15_s10 = int_to_ptr.vmem [resolvable:$true] %s14_s10 }
   0x3   :  { %p543_p1 = scmp.lt.u32.totalorder %s539_s13, %s807_s0 }
   0x5   :  { %p545_p2 = pnand %p543_p1, %p540_p0 }
   0x7   :  { %548 = shalt.err (!%p545_p2)
}
   0x8   :  { %s549_s18 = scalar_lea.vmem %s15_s10, 4096  ;;  %p554_p4 = scmp.lt.s32.totalorder %s15_s10, %s15_s10 }
   0x9   :  { %p550_p3 = scmp.ne.s32.totalorder %s15_s10, %s549_s18  ;;  %p555_p5 = scmp.lt.s32.totalorder %s549_s18, %s549_s18 }
   0xb   :  { %p556_p6 = por %p555_p5, %p554_p4 }
   0xd   :  { %p557_p7 = pnand %p556_p6, %p550_p3 }
   0xf   :  { %560 = shalt.err (!%p557_p7)
}
  0x10   :  { %s588_s19 = smov 256   ;;  %s589_s20 = smov 16  }
  0x11   :  { %20 = dma.hbm_to_vmem [thread:$0]  %s807_s0, 4096, %s15_s10, [#allocation4], %s588_s19, %s588_s19, %s589_s20  }
  0x12   :  { %s590_s23 = smov [#allocation5]   ;;  %s561_s27 = scalar_lea.hbm %s808_s1, 4096 }
  0x13   :  { %s26_s24 = sshll.u32 %s590_s23, 4  ;;  %p562_p8 = scmp.ne.s32.totalorder %s808_s1, %s561_s27  ;;  %s27_s24 = int_to_ptr.vmem [resolvable:$true] %s26_s24 }
  0x14   :  { %p565_p9 = scmp.lt.u32.totalorder %s561_s27, %s808_s1 }
  0x16   :  { %p567_p10 = pnand %p565_p9, %p562_p8 }
  0x18   :  { %570 = shalt.err (!%p567_p10)
}
  0x19   :  { %s571_s4 = scalar_lea.vmem %s27_s24, 4096  ;;  %p576_p12 = scmp.lt.s32.totalorder %s27_s24, %s27_s24 }
  0x1a   :  { %p572_p11 = scmp.ne.s32.totalorder %s27_s24, %s571_s4  ;;  %p577_p13 = scmp.lt.s32.totalorder %s571_s4, %s571_s4 }
  0x1c   :  { %p578_p0 = por %p577_p13, %p576_p12 }
  0x1e   :  { %p579_p1 = pnand %p578_p0, %p572_p11 }
  0x20   :  { %582 = shalt.err (!%p579_p1)
}
  0x21   :  { %32 = dma.hbm_to_vmem [thread:$0]  %s808_s1, 4096, %s27_s24, [#allocation6], %s588_s19, %s588_s19, %s589_s20  }
  0x22   :  { %583 = dma.done.wait [#allocation4], 4096  }
  0x23   :  { %584 = vsyncadd [#allocation4], 4294963200 }
  0x24   :  { %585 = dma.done.wait [#allocation6], 4096  }
  0x25   :  { %586 = vsyncadd [#allocation6], 4294963200  ;;  %vm43_vm0 = vcmask 7168   ;;  %v591_v0 = vmov 0.0   ;;  %v64_v1 = vld [vmem:[#allocation3 + $0x20] sm:$0xff]  ;;  %v65_v2 = vld [vmem:[#allocation3 + $0x28] sm:$0xff] }
  0x26   :  { %46 = vst.msk [vmem:[#allocation2 + $0x10] sm:$0xff] %vm43_vm0, %v591_v0  ;;  %44 = vst.msk [vmem:[#allocation2] sm:$0xff] %vm43_vm0, %v591_v0  ;;  %v96_v3 = vld [vmem:[#allocation5 + $0x20] sm:$0xff]  ;;  %v97_v4 = vld [vmem:[#allocation5 + $0x28] sm:$0xff] }
  0x27   :  { %45 = vst.msk [vmem:[#allocation2 + $0x8] sm:$0xff] %vm43_vm0, %v591_v0  ;;  %47 = vst.msk [vmem:[#allocation2 + $0x18] sm:$0xff] %vm43_vm0, %v591_v0  ;;  %v128_v5 = vsub.f32 %v64_v1, %v96_v3  ;;  %v60_v6 = vld [vmem:[#allocation3] sm:$0xff]  ;;  %v61_v7 = vld [vmem:[#allocation3 + $0x8] sm:$0xff]  ;;  %v129_v8 = vsub.f32 %v65_v2, %v97_v4 }
  0x28   :  { %48 = vst.msk [vmem:[#allocation2 + $0x20] sm:$0xff] %vm43_vm0, %v591_v0  ;;  %49 = vst.msk [vmem:[#allocation2 + $0x28] sm:$0xff] %vm43_vm0, %v591_v0  ;;  %v92_v9 = vld [vmem:[#allocation5] sm:$0xff]  ;;  %v93_v10 = vld [vmem:[#allocation5 + $0x8] sm:$0xff] }
  0x29   :  { %50 = vst.msk [vmem:[#allocation2 + $0x30] sm:$0xff] %vm43_vm0, %v591_v0  ;;  %51 = vst.msk [vmem:[#allocation2 + $0x38] sm:$0xff] %vm43_vm0, %v591_v0  ;;  %v66_v11 = vld [vmem:[#allocation3 + $0x30] sm:$0xff]  ;;  %v160_v12 = vand.u32 2147483647, %v128_v5  ;;  %v124_v13 = vsub.f32 %v60_v6, %v92_v9  ;;  %v125_v14 = vsub.f32 %v61_v7, %v93_v10  ;;  %v67_v15 = vld [vmem:[#allocation3 + $0x38] sm:$0xff] }
  0x2a   :  { %52 = vst.msk [vmem:[#allocation2 + $0x40] sm:$0xff] %vm43_vm0, %v591_v0  ;;  %53 = vst.msk [vmem:[#allocation2 + $0x48] sm:$0xff] %vm43_vm0, %v591_v0  ;;  %v98_v16 = vld [vmem:[#allocation5 + $0x30] sm:$0xff]  ;;  %v99_v17 = vld [vmem:[#allocation5 + $0x38] sm:$0xff]  ;;  %v161_v18 = vand.u32 2147483647, %v129_v8 }
  0x2b   :  { %54 = vst.msk [vmem:[#allocation2 + $0x50] sm:$0xff] %vm43_vm0, %v591_v0  ;;  %55 = vst.msk [vmem:[#allocation2 + $0x58] sm:$0xff] %vm43_vm0, %v591_v0  ;;  %v130_v19 = vsub.f32 %v66_v11, %v98_v16  ;;  %v131_v20 = vsub.f32 %v67_v15, %v99_v17  ;;  %v62_v21 = vld [vmem:[#allocation3 + $0x10] sm:$0xff]  ;;  %v63_v22 = vld [vmem:[#allocation3 + $0x18] sm:$0xff]  ;;  %v192_v24 = vadd.f32 1e-06, %v160_v12 }
  0x2c   :  { %56 = vst.msk [vmem:[#allocation2 + $0x60] sm:$0xff] %vm43_vm0, %v591_v0  ;;  %57 = vst.msk [vmem:[#allocation2 + $0x68] sm:$0xff] %vm43_vm0, %v591_v0  ;;  %v94_v23 = vld [vmem:[#allocation5 + $0x10] sm:$0xff]  ;;  %v156_v25 = vand.u32 2147483647, %v124_v13  ;;  %v95_v34 = vld [vmem:[#allocation5 + $0x18] sm:$0xff] }
  0x2d   :  { %58 = vst.msk [vmem:[#allocation2 + $0x70] sm:$0xff] %vm43_vm0, %v591_v0  ;;  %59 = vst.msk [vmem:[#allocation2 + $0x78] sm:$0xff] %vm43_vm0, %v591_v0  ;;  %v157_v26 = vand.u32 2147483647, %v125_v14  ;;  %v126_v27 = vsub.f32 %v62_v21, %v94_v23  ;;  %v193_v28 = vadd.f32 1e-06, %v161_v18  ;;  %v224_v31 = vmul.f32 %v192_v24, %v192_v24 }
  0x2e   :  { %v162_v29 = vand.u32 2147483647, %v130_v19  ;;  %v163_v30 = vand.u32 2147483647, %v131_v20  ;;  %v188_v32 = vadd.f32 1e-06, %v156_v25  ;;  %v127_v39 = vsub.f32 %v63_v22, %v95_v34 }
  0x2f   :  { %v189_v33 = vadd.f32 1e-06, %v157_v26  ;;  %v70_v35 = vld [vmem:[#allocation3 + $0x50] sm:$0xff]  ;;  %v225_v36 = vmul.f32 %v193_v28, %v193_v28  ;;  %v71_v40 = vld [vmem:[#allocation3 + $0x58] sm:$0xff]  ;;  %v158_v44 = vand.u32 2147483647, %v126_v27 }
  0x30   :  { %v194_v37 = vadd.f32 1e-06, %v162_v29  ;;  %v195_v38 = vadd.f32 1e-06, %v163_v30  ;;  %v102_v41 = vld [vmem:[#allocation5 + $0x50] sm:$0xff]  ;;  %v220_v42 = vmul.f32 %v188_v32, %v188_v32  ;;  %v103_v45 = vld [vmem:[#allocation5 + $0x58] sm:$0xff] }
  0x31   :  { %v221_v43 = vmul.f32 %v189_v33, %v189_v33  ;;  %v134_v46 = vsub.f32 %v70_v35, %v102_v41  ;;  %v68_v47 = vld [vmem:[#allocation3 + $0x40] sm:$0xff]  ;;  %v69_v48 = vld [vmem:[#allocation3 + $0x48] sm:$0xff]  ;;  %v274_v49 = vadd.f32 %v225_v36, %v224_v31  ;;  %v159_v52 = vand.u32 2147483647, %v127_v39  ;;  %v74_v55 = vld [vmem:[#allocation3 + $0x70] sm:$0xff] }
  0x32   :  { %v226_v50 = vmul.f32 %v194_v37, %v194_v37  ;;  %v227_v51 = vmul.f32 %v195_v38, %v195_v38  ;;  %v100_v53 = vld [vmem:[#allocation5 + $0x40] sm:$0xff]  ;;  %v101_v54 = vld [vmem:[#allocation5 + $0x48] sm:$0xff]  ;;  %v190_v57 = vadd.f32 1e-06, %v158_v44  ;;  %v135_v58 = vsub.f32 %v71_v40, %v103_v45  ;;  %v75_v60 = vld [vmem:[#allocation3 + $0x78] sm:$0xff] }
  0x33   :  { %v268_v56 = vadd.f32 %v221_v43, %v220_v42  ;;  %v166_v59 = vand.u32 2147483647, %v134_v46  ;;  %v106_v61 = vld [vmem:[#allocation5 + $0x70] sm:$0xff]  ;;  %275 = vadd.xlane.f32.xlu1 %v274_v49  ;;  %v191_v63 = vadd.f32 1e-06, %v159_v52  ;;  %v132_v0 = vsub.f32 %v68_v47, %v100_v53  ;;  %v107_v2 = vld [vmem:[#allocation5 + $0x78] sm:$0xff] }
  0x34   :  { %v277_v62 = vadd.f32 %v227_v51, %v226_v50  ;;  %v133_v1 = vsub.f32 %v69_v48, %v101_v54  ;;  %v72_v3 = vld [vmem:[#allocation3 + $0x60] sm:$0xff]  ;;  %v222_v4 = vmul.f32 %v190_v57, %v190_v57  ;;  %v167_v5 = vand.u32 2147483647, %v135_v58  ;;  %v73_v8 = vld [vmem:[#allocation3 + $0x68] sm:$0xff]  ;;  %v78_v15 = vld [vmem:[#allocation3 + $0x90] sm:$0xff] }
  0x35   :  { %269 = vadd.xlane.f32.xlu0 %v268_v56  ;;  %v198_v6 = vadd.f32 1e-06, %v166_v59  ;;  %v138_v7 = vsub.f32 %v74_v55, %v106_v61  ;;  %v104_v9 = vld [vmem:[#allocation5 + $0x60] sm:$0xff]  ;;  %v223_v10 = vmul.f32 %v191_v63, %v191_v63  ;;  %v164_v11 = vand.u32 2147483647, %v132_v0  ;;  %v105_v14 = vld [vmem:[#allocation5 + $0x68] sm:$0xff] }
  0x36   :  { %v165_v12 = vand.u32 2147483647, %v133_v1  ;;  %v139_v13 = vsub.f32 %v75_v60, %v107_v2  ;;  %v199_v16 = vadd.f32 1e-06, %v167_v5  ;;  %v136_v19 = vsub.f32 %v72_v3, %v104_v9  ;;  %v79_v20 = vld [vmem:[#allocation3 + $0x98] sm:$0xff]  ;;  %v110_v21 = vld [vmem:[#allocation5 + $0x90] sm:$0xff] }
  0x37   :  { %v230_v17 = vmul.f32 %v198_v6, %v198_v6  ;;  %v170_v18 = vand.u32 2147483647, %v138_v7  ;;  %278 = vadd.xlane.f32.xlu1 %v277_v62  ;;  %v271_v22 = vadd.f32 %v223_v10, %v222_v4  ;;  %v196_v23 = vadd.f32 1e-06, %v164_v11  ;;  %v111_v30 = vld [vmem:[#allocation5 + $0x98] sm:$0xff]  ;;  %v76_v31 = vld [vmem:[#allocation3 + $0x80] sm:$0xff] }
  0x38   :  { %v197_v24 = vadd.f32 1e-06, %v165_v12  ;;  %v171_v25 = vand.u32 2147483647, %v139_v13  ;;  %v231_v26 = vmul.f32 %v199_v16, %v199_v16  ;;  %v137_v28 = vsub.f32 %v73_v8, %v105_v14  ;;  %v77_v36 = vld [vmem:[#allocation3 + $0x88] sm:$0xff]  ;;  %v108_v37 = vld [vmem:[#allocation5 + $0x80] sm:$0xff] }
  0x39   :  { %v202_v27 = vadd.f32 1e-06, %v170_v18  ;;  %v168_v29 = vand.u32 2147483647, %v136_v19  ;;  %272 = vadd.xlane.f32.xlu0 %v271_v22  ;;  %v228_v32 = vmul.f32 %v196_v23, %v196_v23  ;;  %v142_v35 = vsub.f32 %v78_v15, %v110_v21  ;;  %v109_v38 = vld [vmem:[#allocation5 + $0x88] sm:$0xff]  ;;  %v82_v43 = vld [vmem:[#allocation3 + $0xb0] sm:$0xff] }
  0x3a   :  { %v229_v33 = vmul.f32 %v197_v24, %v197_v24  ;;  %v203_v34 = vadd.f32 1e-06, %v171_v25  ;;  %v283_v39 = vadd.f32 %v231_v26, %v230_v17  ;;  %v169_v41 = vand.u32 2147483647, %v137_v28  ;;  %v114_v44 = vld [vmem:[#allocation5 + $0xb0] sm:$0xff]  ;;  %v83_v49 = vld [vmem:[#allocation3 + $0xb8] sm:$0xff] }
  0x3b   :  { %v234_v40 = vmul.f32 %v202_v27, %v202_v27  ;;  %v200_v42 = vadd.f32 1e-06, %v168_v29  ;;  %v143_v47 = vsub.f32 %v79_v20, %v111_v30  ;;  %v174_v48 = vand.u32 2147483647, %v142_v35  ;;  %v115_v50 = vld [vmem:[#allocation5 + $0xb8] sm:$0xff]  ;;  %v80_v55 = vld [vmem:[#allocation3 + $0xa0] sm:$0xff] }
  0x3c   :  { %v280_v45 = vadd.f32 %v229_v33, %v228_v32  ;;  %v235_v46 = vmul.f32 %v203_v34, %v203_v34  ;;  %284 = vadd.xlane.f32.xlu1 %v283_v39  ;;  %v201_v51 = vadd.f32 1e-06, %v169_v41  ;;  %v140_v53 = vsub.f32 %v76_v31, %v108_v37  ;;  %v112_v56 = vld [vmem:[#allocation5 + $0xa0] sm:$0xff]  ;;  %v81_v61 = vld [vmem:[#allocation3 + $0xa8] sm:$0xff]  ;;  %v86_v3 = vld [vmem:[#allocation3 + $0xd0] sm:$0xff] }
  0x3d   :  { %v232_v52 = vmul.f32 %v200_v42, %v200_v42  ;;  %v141_v54 = vsub.f32 %v77_v36, %v109_v38  ;;  %v175_v58 = vand.u32 2147483647, %v143_v47  ;;  %v206_v59 = vadd.f32 1e-06, %v174_v48  ;;  %v113_v2 = vld [vmem:[#allocation5 + $0xa8] sm:$0xff]  ;;  %v87_v8 = vld [vmem:[#allocation3 + $0xd8] sm:$0xff] }
  0x3e   :  { %281 = vadd.xlane.f32.xlu0 %v280_v45  ;;  %v289_v57 = vadd.f32 %v235_v46, %v234_v40  ;;  %v146_v60 = vsub.f32 %v82_v43, %v114_v44  ;;  %v233_v62 = vmul.f32 %v201_v51, %v201_v51  ;;  %v172_v63 = vand.u32 2147483647, %v140_v53  ;;  %v118_v9 = vld [vmem:[#allocation5 + $0xd0] sm:$0xff]  ;;  %v119_v18 = vld [vmem:[#allocation5 + $0xd8] sm:$0xff]  ;;  %v84_v19 = vld [vmem:[#allocation3 + $0xc0] sm:$0xff] }
  0x3f   :  { %v173_v0 = vand.u32 2147483647, %v141_v54  ;;  %v147_v1 = vsub.f32 %v83_v49, %v115_v50  ;;  %v207_v4 = vadd.f32 1e-06, %v175_v58  ;;  %v238_v5 = vmul.f32 %v206_v59, %v206_v59  ;;  %v85_v24 = vld [vmem:[#allocation3 + $0xc8] sm:$0xff]  ;;  %v116_v25 = vld [vmem:[#allocation5 + $0xc0] sm:$0xff] }
  0x40   :  { %v178_v6 = vand.u32 2147483647, %v146_v60  ;;  %v144_v7 = vsub.f32 %v80_v55, %v112_v56  ;;  %290 = vadd.xlane.f32.xlu1 %v289_v57  ;;  %v286_v10 = vadd.f32 %v233_v62, %v232_v52  ;;  %v204_v11 = vadd.f32 1e-06, %v172_v63  ;;  %v117_v26 = vld [vmem:[#allocation5 + $0xc8] sm:$0xff]  ;;  %v90_v31 = vld [vmem:[#allocation3 + $0xf0] sm:$0xff] }
  0x41   :  { %v205_v12 = vadd.f32 1e-06, %v173_v0  ;;  %v179_v13 = vand.u32 2147483647, %v147_v1  ;;  %v239_v14 = vmul.f32 %v207_v4, %v207_v4  ;;  %v145_v16 = vsub.f32 %v81_v61, %v113_v2  ;;  %v122_v32 = vld [vmem:[#allocation5 + $0xf0] sm:$0xff]  ;;  %v91_v37 = vld [vmem:[#allocation3 + $0xf8] sm:$0xff] }
  0x42   :  { %v210_v15 = vadd.f32 1e-06, %v178_v6  ;;  %v176_v17 = vand.u32 2147483647, %v144_v7  ;;  %287 = vadd.xlane.f32.xlu0 %v286_v10  ;;  %v236_v20 = vmul.f32 %v204_v11, %v204_v11  ;;  %v150_v23 = vsub.f32 %v86_v3, %v118_v9  ;;  %v123_v38 = vld [vmem:[#allocation5 + $0xf8] sm:$0xff]  ;;  %v88_v43 = vld [vmem:[#allocation3 + $0xe0] sm:$0xff] }
  0x43   :  { %v237_v21 = vmul.f32 %v205_v12, %v205_v12  ;;  %v211_v22 = vadd.f32 1e-06, %v179_v13  ;;  %v295_v27 = vadd.f32 %v239_v14, %v238_v5  ;;  %v177_v29 = vand.u32 2147483647, %v145_v16  ;;  %v120_v44 = vld [vmem:[#allocation5 + $0xe0] sm:$0xff]  ;;  %v89_v53 = vld [vmem:[#allocation3 + $0xe8] sm:$0xff] }
  0x44   :  { %v242_v28 = vmul.f32 %v210_v15, %v210_v15  ;;  %v208_v30 = vadd.f32 1e-06, %v176_v17  ;;  %v151_v35 = vsub.f32 %v87_v8, %v119_v18  ;;  %v182_v36 = vand.u32 2147483647, %v150_v23  ;;  %v121_v54 = vld [vmem:[#allocation5 + $0xe8] sm:$0xff]  ;;  %v254_v17 = vld [vmem:[#allocation2 + $0x10] sm:$0xff] }
  0x45   :  { %v292_v33 = vadd.f32 %v237_v21, %v236_v20  ;;  %v243_v34 = vmul.f32 %v211_v22, %v211_v22  ;;  %296 = vadd.xlane.f32.xlu1 %v295_v27  ;;  %v209_v39 = vadd.f32 1e-06, %v177_v29  ;;  %v148_v41 = vsub.f32 %v84_v19, %v116_v25  ;;  %v252_v18 = vld [vmem:[#allocation2] sm:$0xff]  ;;  %v255_v23 = vld [vmem:[#allocation2 + $0x18] sm:$0xff]  ;;  %v253_v25 = vld [vmem:[#allocation2 + $0x8] sm:$0xff] }
  0x46   :  { %v240_v40 = vmul.f32 %v208_v30, %v208_v30  ;;  %v149_v42 = vsub.f32 %v85_v24, %v117_v26  ;;  %v183_v46 = vand.u32 2147483647, %v151_v35  ;;  %v214_v47 = vadd.f32 1e-06, %v182_v36  ;;  %v257_v29 = vld [vmem:[#allocation2 + $0x28] sm:$0xff]  ;;  %v259_v36 = vld [vmem:[#allocation2 + $0x38] sm:$0xff] }
  0x47   :  { %293 = vadd.xlane.f32.xlu0 %v292_v33  ;;  %v301_v45 = vadd.f32 %v243_v34, %v242_v28  ;;  %v154_v48 = vsub.f32 %v90_v31, %v122_v32  ;;  %v241_v49 = vmul.f32 %v209_v39, %v209_v39  ;;  %v180_v50 = vand.u32 2147483647, %v148_v41  ;;  %v256_v34 = vld [vmem:[#allocation2 + $0x20] sm:$0xff]  ;;  %v258_v39 = vld [vmem:[#allocation2 + $0x30] sm:$0xff] }
  0x48   :  { %v181_v51 = vand.u32 2147483647, %v149_v42  ;;  %v155_v52 = vsub.f32 %v91_v37, %v123_v38  ;;  %v215_v55 = vadd.f32 1e-06, %v183_v46  ;;  %v246_v56 = vmul.f32 %v214_v47, %v214_v47  ;;  %v260_v47 = vld [vmem:[#allocation2 + $0x40] sm:$0xff] }
  0x49   :  { %v186_v57 = vand.u32 2147483647, %v154_v48  ;;  %v152_v58 = vsub.f32 %v88_v43, %v120_v44  ;;  %302 = vadd.xlane.f32.xlu1 %v301_v45  ;;  %v298_v59 = vadd.f32 %v241_v49, %v240_v40  ;;  %v212_v60 = vadd.f32 1e-06, %v180_v50  ;;  %v261_v45 = vld [vmem:[#allocation2 + $0x48] sm:$0xff] }
  0x4a   :  { %v213_v61 = vadd.f32 1e-06, %v181_v51  ;;  %v187_v62 = vand.u32 2147483647, %v155_v52  ;;  %v247_v63 = vmul.f32 %v215_v55, %v215_v55  ;;  %v153_v1 = vsub.f32 %v89_v53, %v121_v54 }
  0x4b   :  { %v218_v0 = vadd.f32 1e-06, %v186_v57  ;;  %v184_v2 = vand.u32 2147483647, %v152_v58  ;;  %299 = vadd.xlane.f32.xlu0 %v298_v59  ;;  %v244_v3 = vmul.f32 %v212_v60, %v212_v60 }
  0x4c   :  { %v245_v4 = vmul.f32 %v213_v61, %v213_v61  ;;  %v219_v5 = vadd.f32 1e-06, %v187_v62  ;;  %v307_v6 = vadd.f32 %v247_v63, %v246_v56  ;;  %v185_v8 = vand.u32 2147483647, %v153_v1  ;;  %v263_v62 = vld [vmem:[#allocation2 + $0x58] sm:$0xff] }
  0x4d   :  { %v250_v7 = vmul.f32 %v218_v0, %v218_v0  ;;  %v216_v9 = vadd.f32 1e-06, %v184_v2  ;;  %v262_v0 = vld [vmem:[#allocation2 + $0x50] sm:$0xff] }
  0x4e   :  { %v304_v10 = vadd.f32 %v245_v4, %v244_v3  ;;  %v251_v11 = vmul.f32 %v219_v5, %v219_v5  ;;  %308 = vadd.xlane.f32.xlu1 %v307_v6  ;;  %v217_v12 = vadd.f32 1e-06, %v185_v8  ;;  %v265_v5 = vld [vmem:[#allocation2 + $0x68] sm:$0xff] }
  0x4f   :  { %v248_v13 = vmul.f32 %v216_v9, %v216_v9 }
  0x50   :  { %305 = vadd.xlane.f32.xlu0 %v304_v10  ;;  %v313_v14 = vadd.f32 %v251_v11, %v250_v7  ;;  %v249_v15 = vmul.f32 %v217_v12, %v217_v12 }
  0x52   :  { %314 = vadd.xlane.f32.xlu1 %v313_v14  ;;  %v310_v16 = vadd.f32 %v249_v15, %v248_v13  ;;  %v264_v13 = vld [vmem:[#allocation2 + $0x60] sm:$0xff] }
  0x54   :  { %311 = vadd.xlane.f32.xlu0 %v310_v16 }
  0xc0   :  { %v276_v19 = vpop.xlane.xlu1 %275 }
  0xc1   :  { %v318_v20 = vadd.f32 %v276_v19, %v254_v17 }
  0xc2   :  { %v270_v21 = vpop.xlane.xlu0 %269 }
  0xc3   :  { %v316_v22 = vadd.f32 %v270_v21, %v252_v18  ;;  %335 = vst.msk [vmem:[#allocation2 + $0x10] sm:$0xff] %vm43_vm0, %v318_v20  ;;  %v267_v21 = vld [vmem:[#allocation2 + $0x78] sm:$0xff] }
  0xc4   :  { %v279_v24 = vpop.xlane.xlu1 %278 }
  0xc5   :  { %333 = vst.msk [vmem:[#allocation2] sm:$0xff] %vm43_vm0, %v316_v22  ;;  %v319_v26 = vadd.f32 %v279_v24, %v255_v23 }
  0xc6   :  { %v273_v27 = vpop.xlane.xlu0 %272 }
  0xc7   :  { %336 = vst.msk [vmem:[#allocation2 + $0x18] sm:$0xff] %vm43_vm0, %v319_v26  ;;  %v317_v28 = vadd.f32 %v273_v27, %v253_v25 }
  0xc9   :  { %334 = vst.msk [vmem:[#allocation2 + $0x8] sm:$0xff] %vm43_vm0, %v317_v28  ;;  %v285_v30 = vpop.xlane.xlu1 %284 }
  0xca   :  { %v354_v31 = vld [vmem:[#allocation2 + $0x10] sm:$0xff]  ;;  %v321_v32 = vadd.f32 %v285_v30, %v257_v29 }
  0xcb   :  { %v282_v33 = vpop.xlane.xlu0 %281  ;;  %507 = vrsqrt.f32 %v354_v31  ;;  %vm384_vm1 = vcmp.eq.f32.partialorder %v354_v31, inf  ;;  %vm386_vm2 = vcmp.eq.f32.partialorder %v354_v31, 0.0  ;;  %v387_v57 = vand.u32 2147483648, %v354_v31  ;;  %v266_v29 = vld [vmem:[#allocation2 + $0x70] sm:$0xff] }
  0xcc   :  { %v352_v35 = vld [vmem:[#allocation2] sm:$0xff]  ;;  %338 = vst.msk [vmem:[#allocation2 + $0x28] sm:$0xff] %vm43_vm0, %v321_v32  ;;  %v320_v37 = vadd.f32 %v282_v33, %v256_v34 }
  0xcd   :  { %509 = vrsqrt.f32 %v352_v35  ;;  %v291_v38 = vpop.xlane.xlu1 %290  ;;  %vm370_vm3 = vcmp.eq.f32.partialorder %v352_v35, inf  ;;  %v373_v61 = vand.u32 2147483648, %v352_v35  ;;  %vm372_vm4 = vcmp.eq.f32.partialorder %v352_v35, 0.0 }
  0xce   :  { %v652_v40 = vld [vmem:[#allocation2 + $0x18] sm:$0xff]  ;;  %v323_v41 = vadd.f32 %v291_v38, %v259_v36  ;;  %337 = vst.msk [vmem:[#allocation2 + $0x20] sm:$0xff] %vm43_vm0, %v320_v37 }
  0xcf   :  { %511 = vrsqrt.f32 %v652_v40  ;;  %v288_v42 = vpop.xlane.xlu0 %287  ;;  %vm391_vm5 = vcmp.eq.f32.partialorder %v652_v40, inf  ;;  %v394_v9 = vand.u32 2147483648, %v652_v40  ;;  %vm393_vm6 = vcmp.eq.f32.partialorder %v652_v40, 0.0 }
  0xd0   :  { %v656_v43 = vld [vmem:[#allocation2 + $0x8] sm:$0xff]  ;;  %340 = vst.msk [vmem:[#allocation2 + $0x38] sm:$0xff] %vm43_vm0, %v323_v41  ;;  %v322_v44 = vadd.f32 %v288_v42, %v258_v39 }
  0xd1   :  { %513 = vrsqrt.f32 %v656_v43  ;;  %vm377_vm7 = vcmp.eq.f32.partialorder %v656_v43, inf  ;;  %v380_v20 = vand.u32 2147483648, %v656_v43  ;;  %vm379_vm8 = vcmp.eq.f32.partialorder %v656_v43, 0.0 }
  0xd2   :  { %339 = vst.msk [vmem:[#allocation2 + $0x30] sm:$0xff] %vm43_vm0, %v322_v44  ;;  %v297_v46 = vpop.xlane.xlu1 %296 }
  0xd3   :  { %v661_v48 = vld [vmem:[#allocation2 + $0x28] sm:$0xff]  ;;  %v325_v49 = vadd.f32 %v297_v46, %v261_v45 }
  0xd4   :  { %v294_v50 = vpop.xlane.xlu0 %293  ;;  %515 = vrsqrt.f32 %v661_v48  ;;  %vm405_vm9 = vcmp.eq.f32.partialorder %v661_v48, inf  ;;  %v408_v30 = vand.u32 2147483648, %v661_v48  ;;  %vm407_vm10 = vcmp.eq.f32.partialorder %v661_v48, 0.0 }
  0xd5   :  { %v508_v51 = vpop.eup %507  ;;  %342 = vst.msk [vmem:[#allocation2 + $0x48] sm:$0xff] %vm43_vm0, %v325_v49  ;;  %v324_v52 = vadd.f32 %v294_v50, %v260_v47  ;;  %v665_v55 = vld [vmem:[#allocation2 + $0x20] sm:$0xff] }
  0xd6   :  { %v383_v54 = vmul.f32 %v508_v51, %v354_v31  ;;  %v303_v56 = vpop.xlane.xlu1 %302  ;;  %517 = vrsqrt.f32 %v665_v55  ;;  %vm398_vm11 = vcmp.eq.f32.partialorder %v665_v55, inf  ;;  %vm400_vm12 = vcmp.eq.f32.partialorder %v665_v55, 0.0 }
  0xd7   :  { %v510_v53 = vpop.eup %509  ;;  %v668_v59 = vld [vmem:[#allocation2 + $0x38] sm:$0xff]  ;;  %341 = vst.msk [vmem:[#allocation2 + $0x40] sm:$0xff] %vm43_vm0, %v324_v52  ;;  %v327_v10 = vadd.f32 %v303_v56, %v263_v62  ;;  %v401_v39 = vand.u32 2147483648, %v665_v55 }
  0xd8   :  { %v369_v58 = vmul.f32 %v510_v53, %v352_v35  ;;  %v385_v60 = vsel %vm384_vm1, %v354_v31, %v383_v54  ;;  %519 = vrsqrt.f32 %v668_v59  ;;  %v300_v63 = vpop.xlane.xlu0 %299  ;;  %vm419_vm13 = vcmp.eq.f32.partialorder %v668_v59, inf }
  0xd9   :  { %v512_v1 = vpop.eup %511  ;;  %v388_v2 = vsel %vm386_vm2, %v387_v57, %v385_v60  ;;  %v672_v4 = vld [vmem:[#allocation2 + $0x30] sm:$0xff]  ;;  %v326_v11 = vadd.f32 %v300_v63, %v262_v0  ;;  %344 = vst.msk [vmem:[#allocation2 + $0x58] sm:$0xff] %vm43_vm0, %v327_v10  ;;  %vm421_vm14 = vcmp.eq.f32.partialorder %v668_v59, 0.0 }
  0xda   :  { %v371_v3 = vsel %vm370_vm3, %v352_v35, %v369_v58  ;;  %482 = vst.msk [vmem:[%s809_s2 + $0x10] sm:$0xff] %vm43_vm0, %v388_v2  ;;  %v390_v7 = vmul.f32 %v512_v1, %v652_v40  ;;  %521 = vrsqrt.f32 %v672_v4  ;;  %vm412_vm15 = vcmp.eq.f32.partialorder %v672_v4, inf }
  0xdb   :  { %v374_v6 = vsel %vm372_vm4, %v373_v61, %v371_v3  ;;  %v514_v8 = vpop.eup %513  ;;  %v309_v12 = vpop.xlane.xlu1 %308  ;;  %343 = vst.msk [vmem:[#allocation2 + $0x50] sm:$0xff] %vm43_vm0, %v326_v11  ;;  %v415_v51 = vand.u32 2147483648, %v672_v4  ;;  %vm414_vm1 = vcmp.eq.f32.partialorder %v672_v4, 0.0 }
  0xdc   :  { %480 = vst.msk [vmem:[%s809_s2] sm:$0xff] %vm43_vm0, %v374_v6  ;;  %v392_v14 = vsel %vm391_vm5, %v652_v40, %v390_v7  ;;  %v376_v15 = vmul.f32 %v514_v8, %v656_v43  ;;  %v689_v16 = vld [vmem:[#allocation2 + $0x48] sm:$0xff]  ;;  %v329_v17 = vadd.f32 %v309_v12, %v265_v5 }
  0xdd   :  { %v306_v18 = vpop.xlane.xlu0 %305  ;;  %v395_v19 = vsel %vm393_vm6, %v394_v9, %v392_v14  ;;  %523 = vrsqrt.f32 %v689_v16  ;;  %vm433_vm2 = vcmp.eq.f32.partialorder %v689_v16, inf  ;;  %v436_v58 = vand.u32 2147483648, %v689_v16 }
  0xde   :  { %v516_v22 = vpop.eup %515  ;;  %483 = vst.msk [vmem:[%s809_s2 + $0x18] sm:$0xff] %vm43_vm0, %v395_v19  ;;  %v378_v23 = vsel %vm377_vm7, %v656_v43, %v376_v15  ;;  %v702_v24 = vld [vmem:[#allocation2 + $0x40] sm:$0xff]  ;;  %346 = vst.msk [vmem:[#allocation2 + $0x68] sm:$0xff] %vm43_vm0, %v329_v17  ;;  %v328_v25 = vadd.f32 %v306_v18, %v264_v13  ;;  %v422_v43 = vand.u32 2147483648, %v668_v59  ;;  %vm435_vm3 = vcmp.eq.f32.partialorder %v689_v16, 0.0 }
  0xdf   :  { %v381_v26 = vsel %vm379_vm8, %v380_v20, %v378_v23  ;;  %v404_v27 = vmul.f32 %v516_v22, %v661_v48  ;;  %525 = vrsqrt.f32 %v702_v24  ;;  %v315_v28 = vpop.xlane.xlu1 %314  ;;  %vm426_vm4 = vcmp.eq.f32.partialorder %v702_v24, inf }
  0xe0   :  { %481 = vst.msk [vmem:[%s809_s2 + $0x8] sm:$0xff] %vm43_vm0, %v381_v26  ;;  %345 = vst.msk [vmem:[#allocation2 + $0x60] sm:$0xff] %vm43_vm0, %v328_v25  ;;  %v331_v31 = vadd.f32 %v315_v28, %v267_v21  ;;  %v518_v32 = vpop.eup %517  ;;  %v363_v44 = vld [vmem:[#allocation2 + $0x58] sm:$0xff]  ;;  %v429_v63 = vand.u32 2147483648, %v702_v24  ;;  %vm428_vm5 = vcmp.eq.f32.partialorder %v702_v24, 0.0 }
  0xe1   :  { %v406_v33 = vsel %vm405_vm9, %v661_v48, %v404_v27  ;;  %v312_v34 = vpop.xlane.xlu0 %311  ;;  %v397_v37 = vmul.f32 %v518_v32, %v665_v55  ;;  %527 = vrsqrt.f32 %v363_v44  ;;  %vm447_vm6 = vcmp.eq.f32.partialorder %v363_v44, inf }
  0xe2   :  { %v520_v35 = vpop.eup %519  ;;  %v409_v36 = vsel %vm407_vm10, %v408_v30, %v406_v33  ;;  %348 = vst.msk [vmem:[#allocation2 + $0x78] sm:$0xff] %vm43_vm0, %v331_v31  ;;  %v330_v38 = vadd.f32 %v312_v34, %v266_v29  ;;  %v730_v45 = vld [vmem:[#allocation2 + $0x50] sm:$0xff]  ;;  %vm449_vm7 = vcmp.eq.f32.partialorder %v363_v44, 0.0  ;;  %v450_v6 = vand.u32 2147483648, %v363_v44 }
  0xe3   :  { %485 = vst.msk [vmem:[%s809_s2 + $0x28] sm:$0xff] %vm43_vm0, %v409_v36  ;;  %v418_v40 = vmul.f32 %v520_v35, %v668_v59  ;;  %v399_v42 = vsel %vm398_vm11, %v665_v55, %v397_v37  ;;  %529 = vrsqrt.f32 %v730_v45  ;;  %vm440_vm8 = vcmp.eq.f32.partialorder %v730_v45, inf }
  0xe4   :  { %v522_v41 = vpop.eup %521  ;;  %347 = vst.msk [vmem:[#allocation2 + $0x70] sm:$0xff] %vm43_vm0, %v330_v38  ;;  %v402_v46 = vsel %vm400_vm12, %v401_v39, %v399_v42  ;;  %vm442_vm9 = vcmp.eq.f32.partialorder %v730_v45, 0.0  ;;  %v443_v12 = vand.u32 2147483648, %v730_v45 }
  0xe5   :  { %v420_v47 = vsel %vm419_vm13, %v668_v59, %v418_v40  ;;  %v411_v48 = vmul.f32 %v522_v41, %v672_v4  ;;  %v735_v49 = vld [vmem:[#allocation2 + $0x68] sm:$0xff]  ;;  %484 = vst.msk [vmem:[%s809_s2 + $0x20] sm:$0xff] %vm43_vm0, %v402_v46 }
  0xe6   :  { %v423_v50 = vsel %vm421_vm14, %v422_v43, %v420_v47  ;;  %531 = vrsqrt.f32 %v735_v49  ;;  %vm461_vm10 = vcmp.eq.f32.partialorder %v735_v49, inf  ;;  %vm463_vm11 = vcmp.eq.f32.partialorder %v735_v49, 0.0 }
  0xe7   :  { %v524_v52 = vpop.eup %523  ;;  %487 = vst.msk [vmem:[%s809_s2 + $0x38] sm:$0xff] %vm43_vm0, %v423_v50  ;;  %v413_v53 = vsel %vm412_vm15, %v672_v4, %v411_v48  ;;  %v364_v54 = vld [vmem:[#allocation2 + $0x60] sm:$0xff]  ;;  %v464_v15 = vand.u32 2147483648, %v735_v49 }
  0xe8   :  { %v416_v55 = vsel %vm414_vm1, %v415_v51, %v413_v53  ;;  %v432_v56 = vmul.f32 %v524_v52, %v689_v16  ;;  %533 = vrsqrt.f32 %v364_v54  ;;  %vm454_vm12 = vcmp.eq.f32.partialorder %v364_v54, inf }
  0xe9   :  { %v526_v57 = vpop.eup %525  ;;  %486 = vst.msk [vmem:[%s809_s2 + $0x30] sm:$0xff] %vm43_vm0, %v416_v55  ;;  %v367_v59 = vld [vmem:[#allocation2 + $0x78] sm:$0xff]  ;;  %v457_v20 = vand.u32 2147483648, %v364_v54  ;;  %vm456_vm13 = vcmp.eq.f32.partialorder %v364_v54, 0.0 }
  0xea   :  { %v434_v60 = vsel %vm433_vm2, %v689_v16, %v432_v56  ;;  %v425_v61 = vmul.f32 %v526_v57, %v702_v24  ;;  %535 = vrsqrt.f32 %v367_v59  ;;  %vm475_vm14 = vcmp.eq.f32.partialorder %v367_v59, inf }
  0xeb   :  { %v437_v62 = vsel %vm435_vm3, %v436_v58, %v434_v60  ;;  %v366_v0 = vld [vmem:[#allocation2 + $0x70] sm:$0xff]  ;;  %v528_v3 = vpop.eup %527  ;;  %v478_v26 = vand.u32 2147483648, %v367_v59  ;;  %vm477_vm15 = vcmp.eq.f32.partialorder %v367_v59, 0.0 }
  0xec   :  { %489 = vst.msk [vmem:[%s809_s2 + $0x48] sm:$0xff] %vm43_vm0, %v437_v62  ;;  %v427_v1 = vsel %vm426_vm4, %v702_v24, %v425_v61  ;;  %537 = vrsqrt.f32 %v366_v0  ;;  %v446_v4 = vmul.f32 %v528_v3, %v363_v44  ;;  %vm468_vm1 = vcmp.eq.f32.partialorder %v366_v0, inf }
  0xed   :  { %v430_v2 = vsel %vm428_vm5, %v429_v63, %v427_v1  ;;  %v530_v5 = vpop.eup %529  ;;  %v471_v29 = vand.u32 2147483648, %v366_v0  ;;  %vm470_vm2 = vcmp.eq.f32.partialorder %v366_v0, 0.0 }
  0xee   :  { %488 = vst.msk [vmem:[%s809_s2 + $0x40] sm:$0xff] %vm43_vm0, %v430_v2  ;;  %v448_v8 = vsel %vm447_vm6, %v363_v44, %v446_v4  ;;  %v439_v9 = vmul.f32 %v530_v5, %v730_v45 }
  0xef   :  { %v451_v11 = vsel %vm449_vm7, %v450_v6, %v448_v8 }
  0xf0   :  { %v532_v7 = vpop.eup %531  ;;  %491 = vst.msk [vmem:[%s809_s2 + $0x58] sm:$0xff] %vm43_vm0, %v451_v11  ;;  %v441_v14 = vsel %vm440_vm8, %v730_v45, %v439_v9 }
  0xf1   :  { %v460_v13 = vmul.f32 %v532_v7, %v735_v49  ;;  %v444_v18 = vsel %vm442_vm9, %v443_v12, %v441_v14 }
  0xf2   :  { %v534_v10 = vpop.eup %533  ;;  %490 = vst.msk [vmem:[%s809_s2 + $0x50] sm:$0xff] %vm43_vm0, %v444_v18 }
  0xf3   :  { %v453_v16 = vmul.f32 %v534_v10, %v364_v54  ;;  %v462_v19 = vsel %vm461_vm10, %v735_v49, %v460_v13 }
  0xf4   :  { %v536_v17 = vpop.eup %535  ;;  %v465_v22 = vsel %vm463_vm11, %v464_v15, %v462_v19 }
  0xf5   :  { %v455_v23 = vsel %vm454_vm12, %v364_v54, %v453_v16  ;;  %v474_v24 = vmul.f32 %v536_v17, %v367_v59  ;;  %493 = vst.msk [vmem:[%s809_s2 + $0x68] sm:$0xff] %vm43_vm0, %v465_v22 }
  0xf6   :  { %v538_v21 = vpop.eup %537  ;;  %v458_v25 = vsel %vm456_vm13, %v457_v20, %v455_v23 }
  0xf7   :  { %v467_v27 = vmul.f32 %v538_v21, %v366_v0  ;;  %492 = vst.msk [vmem:[%s809_s2 + $0x60] sm:$0xff] %vm43_vm0, %v458_v25  ;;  %v476_v28 = vsel %vm475_vm14, %v367_v59, %v474_v24 }
  0xf8   :  { %v479_v30 = vsel %vm477_vm15, %v478_v26, %v476_v28 }
  0xf9   :  { %v469_v31 = vsel %vm468_vm1, %v366_v0, %v467_v27  ;;  %495 = vst.msk [vmem:[%s809_s2 + $0x78] sm:$0xff] %vm43_vm0, %v479_v30 }
  0xfa   :  { %v472_v32 = vsel %vm470_vm2, %v471_v29, %v469_v31 }
  0xfb   :  { %494 = vst.msk [vmem:[%s809_s2 + $0x70] sm:$0xff] %vm43_vm0, %v472_v32 }
  0xfc   :  { %500 = vsyncpa [#allocation4], 1 }
  0xfd   :  { %501 = vsyncpa [#allocation6], 1 }

</bundles_post_ra>
